<compile_context>
chip_gen: v6e
topology: v6e:2x2x1
jax: 0.10.0
libtpu: 0.0.40
codegen_flags: <defaults>
</compile_context>

<pallas_src>
import jax
import jax.numpy as jnp
from jax.experimental import pallas as pl
from jax.experimental.pallas import tpu as pltpu


def _round_up(x, m):
    return -(-x // m) * m


def _padded_bytes(r, c, itemsize):
    """VMEM bytes occupied by an (r, c) buffer after (8, 128) tile padding."""
    return _round_up(max(r, 1), 8) * _round_up(max(c, 1), 128) * itemsize


_TM_CAP = 2048  # row-tile cap: blocks already amortize ~0.35us/step overhead.


def _choose_tiles(rows, hw, itemsize, block_bytes):
    """Pick (tm, thw) honoring TPU tiling rules with padded-VMEM accounting.

    Input block (tm, thw): tm % 8 == 0 or tm == rows; thw % 128 == 0 or == hw.
    Output block (2, tm) (lane-dense): tm % 128 == 0 or tm == rows.
    """
    hw_pad = _round_up(hw, 128)
    # Rows per block that fit the budget with the full spatial extent resident.
    row_budget = block_bytes // (hw_pad * itemsize)

    # Small problems: a single row block (can't split lane-dense below 128).
    if rows <= max(row_budget, 8) and rows < 256:
        return rows, hw

    if row_budget >= 128:
        # Tile rows only; full spatial extent per block.
        tm = min((row_budget // 128) * 128, _TM_CAP)
        if rows >= 256:
            # Keep >= 2 row blocks for v7x megacore sharding.
            tm = min(tm, _round_up(pl.cdiv(rows, 2), 128))
        if tm >= rows:
            tm = rows
        return tm, hw

    # Large spatial extent: minimal legal row tile, tile the hw axis too.
    tm = rows if rows < 128 else 128
    tm_pad = _round_up(tm, 8)
    thw = max(((block_bytes // (tm_pad * itemsize)) // 128) * 128, 128)
    if thw >= hw:
        return tm, hw
    if hw % 128 == 0:
        while hw % thw:      # exact divisor -> no ragged-tail mask needed
            thw -= 128
    return tm, thw


def _make_fast_kernel(hw_total, out_dtype):
    """Single-pass kernel: whole spatial extent resident per row block."""
    inv_hw = 1.0 / float(hw_total)

    def kernel(x_ref, out_ref):
        x = x_ref[...]                                     # (tm, hw)
        mx = jnp.max(x, axis=-1)                           # (tm,), native dtype
        sm = jnp.sum(x, axis=-1, dtype=jnp.float32)        # (tm,), f32 accum
        out_ref[...] = jnp.concatenate(
            [mx.astype(out_dtype)[None, :],
             (sm * inv_hw).astype(out_dtype)[None, :]],
            axis=0,
        )

    return kernel


def _make_streaming_kernel(hw_total, thw, n_hw, out_dtype):
    """Multi-step kernel: hw axis tiled, f32 running max/sum scratch."""
    needs_mask = (thw * n_hw) != hw_total
    tail_valid = hw_total - (n_hw - 1) * thw               # static
    inv_hw = 1.0 / float(hw_total)

    def kernel(x_ref, out_ref, max_sc, sum_sc):
        k = pl.program_id(1)

        @pl.when(k == 0)
        def _init():
            max_sc[...] = jnp.full_like(max_sc, -jnp.inf)
            sum_sc[...] = jnp.zeros_like(sum_sc)

        x = x_ref[...]                                     # (tm, thw)

        def accumulate(xm, xs):
            max_sc[...] = jnp.maximum(
                max_sc[...],
                jnp.max(xm, axis=-1, keepdims=True).astype(jnp.float32))
            sum_sc[...] = sum_sc[...] + jnp.sum(
                xs, axis=-1, keepdims=True, dtype=jnp.float32)

        if needs_mask:
            # Mask work only on the final (ragged) spatial step.
            @pl.when(k < n_hw - 1)
            def _body():
                accumulate(x, x)

            @pl.when(k == n_hw - 1)
            def _tail():
                lane = jax.lax.broadcasted_iota(jnp.int32, x.shape, 1)
                valid = lane < tail_valid
                xm = jnp.where(valid, x, jnp.asarray(-jnp.inf, dtype=x.dtype))
                xs = jnp.where(valid, x, jnp.asarray(0, dtype=x.dtype))
                accumulate(xm, xs)
        else:
            accumulate(x, x)

        @pl.when(k == n_hw - 1)
        def _finalize():
            mx = max_sc[...][:, 0]                         # (tm,)
            av = sum_sc[...][:, 0] * inv_hw                # (tm,)
            out_ref[...] = jnp.concatenate(
                [mx.astype(out_dtype)[None, :],
                 av.astype(out_dtype)[None, :]],
                axis=0,
            )

    return kernel


def adaptive_concat_pool2d(x, sz=None, *, block_bytes=4 * 1024 * 1024):
    """Equivalent of AdaptiveConcatPool2d(sz).forward(x) for sz in (None, 1)."""
    output_size = 1 if sz is None else sz
    assert output_size == 1, "only global (1x1) adaptive pooling implemented"
    # TODO(synk): general adaptive pooling (output_size > 1, uneven bins) is not
    # implemented; the module is used with sz=None (global pooling).
    assert jnp.issubdtype(x.dtype, jnp.floating), "floating dtypes only"
    # TODO(synk): integer inputs would need an integer max accumulator and
    # explicitly defined mean/rounding semantics.

    N, C, H, W = x.shape
    rows, hw = N * C, H * W
    x2d = x.reshape(rows, hw)
    itemsize = jnp.dtype(x.dtype).itemsize

    tm, thw = _choose_tiles(rows, hw, itemsize, block_bytes)
    n_row = pl.cdiv(rows, tm)
    n_hw = pl.cdiv(hw, thw)

    # Padded-footprint accounting: 2x input bufs + 2x output bufs + scratch.
    vmem_need = (2 * _padded_bytes(tm, thw, itemsize)
                 + 2 * _padded_bytes(2, tm, itemsize)
                 + (2 * _padded_bytes(tm, 1, 4) if n_hw > 1 else 0))
    vmem_limit = int(min(max(vmem_need + (8 << 20), 16 << 20), 32 << 20))

    cost = pl.CostEstimate(
        flops=2 * rows * hw,
        transcendentals=0,
        bytes_accessed=rows * hw * itemsize + 2 * rows * itemsize,
    )

    if n_hw == 1:
        # Fast path: one pass per row block, no scratch, no accumulator gating.
        kernel = _make_fast_kernel(hw, x.dtype)
        grid_spec = pltpu.PrefetchScalarGridSpec(
            num_scalar_prefetch=0,
            grid=(n_row,),
            in_specs=[pl.BlockSpec((tm, hw), lambda i: (i, 0))],
            out_specs=pl.BlockSpec((2, tm), lambda i: (0, i)),
        )
        dims = ("parallel",)
    else:
        # Streaming path: spatial reduction axis last, f32 running max/sum.
        kernel = _make_streaming_kernel(hw, thw, n_hw, x.dtype)
        grid_spec = pltpu.PrefetchScalarGridSpec(
            num_scalar_prefetch=0,
            grid=(n_row, n_hw),
            in_specs=[pl.BlockSpec((tm, thw), lambda i, k: (i, k))],
            out_specs=pl.BlockSpec((2, tm), lambda i, k: (0, i)),
            scratch_shapes=[
                pltpu.VMEM((tm, 1), jnp.float32),  # running max
                pltpu.VMEM((tm, 1), jnp.float32),  # running sum
            ],
        )
        dims = ("parallel", "arbitrary")

    out2 = pl.pallas_call(
        kernel,
        out_shape=jax.ShapeDtypeStruct((2, rows), x.dtype),
        grid_spec=grid_spec,
        compiler_params=pltpu.CompilerParams(
            dimension_semantics=dims,
            vmem_limit_bytes=vmem_limit,
        ),
        cost_estimate=cost,
    )(x2d)

    mx = out2[0].reshape(N, C, 1, 1)
    av = out2[1].reshape(N, C, 1, 1)
    return jnp.concatenate([mx, av], axis=1)


def _reference(x):
    return jnp.concatenate(
        [
            jnp.max(x, axis=(2, 3), keepdims=True),
            jnp.mean(x, axis=(2, 3), keepdims=True),
        ],
        axis=1,
    )


if __name__ == "__main__":
    key = jax.random.PRNGKey(0)
    k1, k2, k3, k4 = jax.random.split(key, 4)

    # 1) Module-sized input, default tiling -> single-block fast path.
    N, C, H, W = 2, 4, 16, 16
    x = jax.random.normal(k1, (N, C, H, W), dtype=jnp.float32)
    out = jax.block_until_ready(adaptive_concat_pool2d(x, sz=None))
    ref = _reference(x)
    assert out.shape == (N, 2 * C, 1, 1), out.shape
    assert jnp.allclose(out, ref, atol=1e-5, rtol=1e-5)

    # 2) Tiny budget -> streaming path with ragged-tail masking on the last
    #    spatial step (all-negative data catches bad max padding).
    x2 = jax.random.normal(k2, (2, 8, 20, 20), dtype=jnp.float32) - 3.0
    out2 = jax.block_until_ready(adaptive_concat_pool2d(x2, block_bytes=4096))
    assert out2.shape == (2, 16, 1, 1), out2.shape
    assert jnp.allclose(out2, _reference(x2), atol=1e-5, rtol=1e-5)

    # 3) Many rows, small spatial head (7x7) -> fast path with multiple
    #    128-aligned row blocks (megacore split) and a ragged row tail.
    x3 = jax.random.normal(k3, (3, 128, 7, 7), dtype=jnp.float32)
    out3 = jax.block_until_ready(adaptive_concat_pool2d(x3))
    assert out3.shape == (3, 256, 1, 1), out3.shape
    assert jnp.allclose(out3, _reference(x3), atol=1e-5, rtol=1e-5)

    # 4) hw divisible by 128 + tiny budget -> streaming path with no masking.
    x4 = jax.random.normal(k4, (2, 8, 16, 32), dtype=jnp.float32)
    out4 = jax.block_until_ready(adaptive_concat_pool2d(x4, block_bytes=4096))
    assert out4.shape == (2, 16, 1, 1), out4.shape
    assert jnp.allclose(out4, _reference(x4), atol=1e-5, rtol=1e-5)

    print("KERNEL_OK")
</pallas_src>

<mosaic_0001>
module attributes {stable_mosaic.version = 11 : i64} {
  func.func @kernel(%arg0: i32, %arg1: memref<8x256xf32, #tpu.memory_space<vmem>>, %arg2: memref<2x8xf32, #tpu.memory_space<vmem>>) attributes {dimension_semantics = [#tpu.dimension_semantics<parallel>], iteration_bounds = array<i64: 1>, scalar_prefetch = 0 : i64, scratch_operands = 0 : i64, tpu.core_type = #tpu.core_type<tc>, window_params = [{transform_indices = @transform_0, window_bounds = array<i64: 8, 256>}, {transform_indices = @transform_1, window_bounds = array<i64: 2, 8>}]} {
    %c0 = arith.constant 0 : index
    %c0_0 = arith.constant 0 : index
    %0 = vector.load %arg1[%c0, %c0_0] : memref<8x256xf32, #tpu.memory_space<vmem>>, vector<8x256xf32>
    %cst = arith.constant dense<0xFF800000> : vector<8xf32>
    %1 = vector.multi_reduction <maximumf>, %0, %cst [1] : vector<8x256xf32> to vector<8xf32>
    %cst_1 = arith.constant dense<0.000000e+00> : vector<8xf32>
    %2 = vector.multi_reduction <add>, %0, %cst_1 [1] : vector<8x256xf32> to vector<8xf32>
    %3 = vector.shape_cast %1 : vector<8xf32> to vector<1x8xf32>
    %cst_2 = arith.constant 3.906250e-03 : f32
    %4 = vector.broadcast %cst_2 : f32 to vector<8xf32>
    %5 = arith.mulf %2, %4 : vector<8xf32>
    %6 = vector.shape_cast %5 : vector<8xf32> to vector<1x8xf32>
    %7 = tpu.concatenate %3, %6 in 0 : vector<1x8xf32>, vector<1x8xf32> -> vector<2x8xf32>
    %c0_3 = arith.constant 0 : index
    %c0_4 = arith.constant 0 : index
    %8 = vector.load %arg2[%c0_3, %c0_4] : memref<2x8xf32, #tpu.memory_space<vmem>>, vector<2x8xf32>
    tpu.vector_store %arg2[%c0_3, %c0_4], %7 {strides = array<i32>} : memref<2x8xf32, #tpu.memory_space<vmem>>, vector<2x8xf32>,
    return
  }
  func.func @transform_0(%arg0: i32) -> (i32, i32) {
    %c0_i32 = arith.constant 0 : i32
    %c0_i32_0 = arith.constant 0 : i32
    return %arg0, %c0_i32 : i32, i32
  }
  func.func @transform_1(%arg0: i32) -> (i32, i32) {
    %c0_i32 = arith.constant 0 : i32
    %c0_i32_0 = arith.constant 0 : i32
    return %c0_i32, %arg0 : i32, i32
  }
}

</mosaic_0001>

<bundles_post_ra>
// kernel: tpu_custom_call.1
= control target key start
LH: loop header
LB: loop body
LE: loop exit
PB: predicated region body
PF: predicated region fallthrough
CT: control target
= control target key end

     0   :  { %6 = vsyncpa [#allocation3], 0  ;;  %s127_s0 = inlined_call_operand.hbm [shape: f32[8,256], index: 0, kind: input, shape index: {}]   ;;  %s128_s1 = inlined_call_operand.hbm [shape: f32[2,8], index: 1, kind: output, shape index: {}]  }
   0x1   :  { %7 = vsyncpa [#allocation4], 0  ;;  %s109_s6 = smov [#allocation2]  }
   0x2   :  { %s14_s7 = sshll.u32 %s109_s6, 4  ;;  %s15_s7 = int_to_ptr.vmem [resolvable:$true] %s14_s7 }
   0x3   :  { %s73_s8 = scalar_lea.vmem %s15_s7, 256  ;;  %p78_p1 = scmp.lt.s32.totalorder %s15_s7, %s15_s7 }
   0x4   :  { %p74_p0 = scmp.ne.s32.totalorder %s15_s7, %s73_s8  ;;  %p79_p2 = scmp.lt.s32.totalorder %s73_s8, %s73_s8 }
   0x6   :  { %p80_p3 = por %p79_p2, %p78_p1 }
   0x8   :  { %p81_p4 = pnand %p80_p3, %p74_p0 }
   0xa   :  { %84 = shalt.err (!%p81_p4)
}
   0xb   :  { %17 = dma.hbm_to_vmem [thread:$0]  %s127_s0, 256, %s15_s7, [#allocation3]  }
   0xc   :  { %105 = dma.done.wait [#allocation3], 256  }
   0xd   :  { %106 = vsyncadd [#allocation3], 4294967040  ;;  %v21_v0 = vld [vmem:[#allocation2] sm:$0xff]  ;;  %v22_v1 = vld [vmem:[#allocation2 + $0x8] sm:$0xff]  ;;  %v31_v4 = vlaneseq  ;;  %s110_s11 = smov [#allocation5]   ;;  %vm44_vm0 = vcmask 1040384  }
   0xe   :  { %v26_v2 = vadd.f32 %v22_v1, %v21_v0  ;;  %v23_v3 = vmax.f32 %v21_v0, %v22_v1  ;;  %s54_s12 = sshll.u32 %s110_s11, 4  ;;  %vm46_vm1 = vcmask 58368   ;;  %s55_s12 = int_to_ptr.vmem [resolvable:$true] %s54_s12 }
   0xf   :  { %v32_v5 = vand.u32 127, %v31_v4  ;;  %v34_v6 = vshrl.u32 %v31_v4, 7  ;;  %s85_s0 = scalar_lea.vmem %s55_s12, 32  ;;  %p90_p6 = scmp.lt.s32.totalorder %s55_s12, %s55_s12 }
  0x10   :  { %27 = vadd.xlane.f32.xlu0 %v26_v2  ;;  %p86_p5 = scmp.ne.s32.totalorder %s55_s12, %s85_s0  ;;  %p91_p7 = scmp.lt.s32.totalorder %s85_s0, %s85_s0 }
  0x11   :  { %v35_v8 = vsub.s32 %v32_v5, %v34_v6 }
  0x12   :  { %p92_p8 = por %p91_p7, %p90_p6 }
  0x14   :  { %24 = vmax.xlane.f32.xlu0 %v23_v3  ;;  %p93_p9 = pnand %p92_p8, %p86_p5 }
  0x99   :  { %v28_v7 = vpop.xlane.xlu0 %27 }
  0x9a   :  { %v29_v9 = vmul.f32 0.00390625, %v28_v7 }
  0x9c   :  { %v42_v11 = vrot.slane %v29_v9, %v35_v8 }
  0x9d   :  { %v25_v10 = vpop.xlane.xlu0 %24 }
  0x9e   :  { %v36_v12 = vrot.slane %v25_v10, %v35_v8 }
  0xa0   :  { %v45_v13 = vsel %vm44_vm0, %v36_v12, %v42_v11 }
  0xa1   :  { %47 = vst.msk [vmem:[#allocation5] sm:$0x3] %vm46_vm1, %v45_v13 }
  0xa2   :  { %96 = shalt.err (!%p93_p9)
}
  0xa3   :  { %57 = dma.vmem_to_hbm [thread:$0]  %s55_s12, 32, %s128_s1, [#allocation4]  }
  0xa4   :  { %107 = dma.done.wait [#allocation4], 32  }
  0xa5   :  { %108 = vsyncadd [#allocation4], 4294967264 }
  0xa6   :  { %61 = vsyncpa [#allocation3], 1 }
  0xa7   :  { %62 = vsyncpa [#allocation4], 1 }

</bundles_post_ra>
